<compile_context>
chip_gen: v6e
topology: v6e:2x2x1
jax: 0.10.0
libtpu: 0.0.40
codegen_flags: <defaults>
</compile_context>

<pallas_src>
import jax
import jax.numpy as jnp
from jax import lax
from jax.experimental import pallas as pl
from jax.experimental.pallas import tpu as pltpu

_LANES = 128
_SUBLANES = 8


def _chip_profile():
    """(native_compare_ok, min_tiles, vmem_budget_bytes, vmem_limit_bytes) per chip generation."""
    kind = ""
    try:
        kind = jax.devices()[0].device_kind.lower()
    except Exception:
        pass
    old_gen = any(tag in kind for tag in ("v2", "v3", "v4", "v5"))   # no bf16 VPU path
    is_v7 = "v7" in kind
    native_compare_ok = not old_gen
    # v7x shards a "parallel" grid axis across its 2 TensorCores -> make sure there are tiles
    # to shard; on single-TC chips extra tiles just add ~0.35us/step, so keep 1.
    min_tiles = 8 if is_v7 else 1
    if is_v7 or not kind:
        # 64 MiB physical VMEM per TC -> stay well under the 32 MiB scoped limit.
        vmem_budget = 24 * 1024 * 1024
        vmem_limit = 32 * 1024 * 1024
    else:
        # v5e/v6e: 128 MiB physical -> bigger tiles amortize per-grid-step overhead.
        vmem_budget = 48 * 1024 * 1024
        vmem_limit = 64 * 1024 * 1024
    return native_compare_ok, min_tiles, vmem_budget, vmem_limit


def _choose_tile_rows(n, c, itemsize, vmem_budget, min_tiles, block_rows=None):
    """Largest multiple-of-8 row tile whose full working set (double-buffered input tile +
    ~4 live f32 temporaries + lane-padded targets) stays within the VMEM budget, capped so
    the grid has at least `min_tiles` tiles when N allows it."""
    if block_rows is not None:
        tn = max(_SUBLANES, (int(block_rows) // _SUBLANES) * _SUBLANES)
    else:
        c_pad = pl.cdiv(c, _LANES) * _LANES          # lane padding in VMEM
        bytes_per_row = (2 * c_pad * itemsize        # double-buffered input tile
                         + 4 * c_pad * 4             # ~4 live f32 (TN, C) temporaries
                         + _LANES * 4)               # lane-padded int32 target row
        tn = (vmem_budget // bytes_per_row) // _SUBLANES * _SUBLANES
        tn = max(_SUBLANES, min(int(tn), 8192))
        if min_tiles > 1 and n > _SUBLANES:
            per_tile = pl.cdiv(pl.cdiv(n, min_tiles), _SUBLANES) * _SUBLANES
            tn = min(tn, max(_SUBLANES, per_tile))
    if n <= tn:
        return n                                     # full-dim block is always layout-legal
    return tn


def _focal_partial_kernel(n_rows, tile_rows, native_compare):
    """Per-tile partial sum of the NLL (the cross-entropy numerator)."""

    def kernel(x_ref, t_ref, o_ref):
        i = pl.program_id(0)

        x_nat = x_ref[...]                                           # (TN, C) native dtype
        tgt = t_ref[...]                                             # (TN, 1) int32
        col = lax.broadcasted_iota(jnp.int32, x_nat.shape, 1)        # (TN, C)
        hit = col == tgt                                             # (TN, C) bool

        if native_compare and x_nat.dtype != jnp.float32:
            # v6e/v7x: row max + target select in the packed native dtype (2x elems per VALU
            # op, no full f32 copy for the gather path); exp/sum-exp stay in f32.
            m_f32 = jnp.max(x_nat, axis=-1, keepdims=True).astype(jnp.float32)
            picked = jnp.sum(jnp.where(hit, x_nat, jnp.zeros_like(x_nat)),
                             axis=-1, keepdims=True).astype(jnp.float32)
            gathered = picked - m_f32                                # == z[target]
            z = x_nat.astype(jnp.float32) - m_f32                    # (TN, C) f32
        else:
            x = x_nat.astype(jnp.float32)                            # (TN, C) f32
            m_f32 = jnp.max(x, axis=-1, keepdims=True)               # (TN, 1)
            z = x - m_f32                                            # (TN, C)
            gathered = jnp.sum(jnp.where(hit, z, 0.0),               # select, no onehot-mul
                               axis=-1, keepdims=True)               # (TN, 1)

        # numerically stable log-sum-exp; exactly one exp per logit (keep EUP under roofline)
        lse = jnp.log(jnp.sum(jnp.exp(z), axis=-1, keepdims=True))   # (TN, 1)
        nll = lse - gathered                                         # -(log_softmax[target])

        # mask rows of the (possibly padded) final tile with a select so NaN/Inf garbage in
        # padded rows cannot propagate; the mean divisor stays the true N outside.
        row = lax.broadcasted_iota(jnp.int32, nll.shape, 0) + i * tile_rows
        nll = jnp.where(row < n_rows, nll, 0.0)

        # lane-dense partial-sum block (one full vreg, unmasked store)
        o_ref[...] = jnp.full(o_ref.shape, jnp.sum(nll), jnp.float32)

    return kernel


def focal_loss(logits, target, gamma=0.0, block_rows=None):
    """logits: (N, C) float (any float dtype, NOT pre-cast), target: (N,) int -> scalar f32."""
    n, c = logits.shape
    itemsize = jnp.dtype(logits.dtype).itemsize
    native_ok, min_tiles, vmem_budget, vmem_limit = _chip_profile()
    tn = _choose_tile_rows(n, c, itemsize, vmem_budget, min_tiles, block_rows)
    num_tiles = pl.cdiv(n, tn)

    t2d = target.astype(jnp.int32).reshape(n, 1)

    cost = pl.CostEstimate(
        flops=7 * n * c,
        transcendentals=n * c,                   # exp() per logit (+ one log per row)
        bytes_accessed=n * c * itemsize + n * 4 + num_tiles * _SUBLANES * _LANES * 4,
    )

    partials = pl.pallas_call(
        _focal_partial_kernel(n, tn, native_ok),
        out_shape=jax.ShapeDtypeStruct((num_tiles, _SUBLANES, _LANES), jnp.float32),
        grid=(num_tiles,),
        in_specs=[
            pl.BlockSpec((tn, c), lambda i: (i, 0)),
            pl.BlockSpec((tn, 1), lambda i: (i, 0)),
        ],
        out_specs=pl.BlockSpec((1, _SUBLANES, _LANES), lambda i: (i, 0, 0)),
        compiler_params=pltpu.CompilerParams(
            dimension_semantics=("parallel",),
            vmem_limit_bytes=vmem_limit,
        ),
        cost_estimate=cost,
    )(logits, t2d)

    # Tiny O(num_tiles) finalize on the partial sums: mean CE + focal transform.
    logp = jnp.sum(partials[:, 0, 0]) / jnp.float32(n)
    p = jnp.exp(-logp)
    loss = (1.0 - p) ** gamma * logp
    return loss.astype(jnp.float32)


def focal_loss_ref(logits, target, gamma=0.0):
    # pure-JAX reference for correctness check
    logits = logits.astype(jnp.float32)
    log_soft = jax.nn.log_softmax(logits, axis=-1)
    nll = -jnp.take_along_axis(log_soft, target[:, None].astype(jnp.int32), axis=-1)[:, 0]
    logp = jnp.mean(nll)
    p = jnp.exp(-logp)
    return (1.0 - p) ** gamma * logp


if __name__ == "__main__":
    key = jax.random.PRNGKey(0)
    k1, k2, k3, k4 = jax.random.split(key, 4)

    # small shapes consistent with a classification head: batch=8, classes=32
    N, C = 8, 32
    logits_f32 = jax.random.normal(k1, (N, C), dtype=jnp.float32)
    target = jax.random.randint(k2, (N,), 0, C, dtype=jnp.int32)

    for gamma in (0.0, 2.0):
        out = jax.block_until_ready(focal_loss(logits_f32, target, gamma=gamma))
        ref = focal_loss_ref(logits_f32, target, gamma=gamma)
        assert jnp.allclose(out, ref, rtol=1e-5, atol=1e-6), (gamma, out, ref)

    # bf16 logits ingested directly (no wrapper-side f32 cast; native-dtype compare/select
    # path on v6e/v7x, f32 fallback on v5e)
    logits_bf16 = jax.random.normal(k3, (N, C), dtype=jnp.bfloat16)
    out = jax.block_until_ready(focal_loss(logits_bf16, target, gamma=2.0))
    ref = focal_loss_ref(logits_bf16, target, gamma=2.0)
    assert jnp.allclose(out, ref, rtol=1e-4, atol=1e-5), (out, ref)

    # ragged batch (N % TN != 0) exercising the tiled "parallel" grid + row masking
    N2 = 20
    logits2 = jax.random.normal(k4, (N2, C), dtype=jnp.float32)
    target2 = jax.random.randint(k2, (N2,), 0, C, dtype=jnp.int32)
    out = jax.block_until_ready(focal_loss(logits2, target2, gamma=2.0, block_rows=8))
    ref = focal_loss_ref(logits2, target2, gamma=2.0)
    assert jnp.allclose(out, ref, rtol=1e-5, atol=1e-6), (out, ref)

    # ragged batch with the automatic tile heuristic (also exercises min_tiles capping on v7x)
    out = jax.block_until_ready(focal_loss(logits2, target2, gamma=2.0))
    assert jnp.allclose(out, ref, rtol=1e-5, atol=1e-6), (out, ref)

    print("KERNEL_OK")
</pallas_src>

<mosaic_0001>
module attributes {stable_mosaic.version = 11 : i64} {
  func.func @kernel(%arg0: i32, %arg1: memref<8x32xf32, #tpu.memory_space<vmem>>, %arg2: memref<8x1xi32, #tpu.memory_space<vmem>>, %arg3: memref<1x8x128xf32, #tpu.memory_space<vmem>>) attributes {dimension_semantics = [#tpu.dimension_semantics<parallel>], iteration_bounds = array<i64: 1>, scalar_prefetch = 0 : i64, scratch_operands = 0 : i64, tpu.core_type = #tpu.core_type<tc>, window_params = [{transform_indices = @transform_0, window_bounds = array<i64: 8, 32>}, {transform_indices = @transform_1, window_bounds = array<i64: 8, 1>}, {transform_indices = @transform_2, window_bounds = array<i64: 1, 8, 128>}]} {
    %c0 = arith.constant 0 : index
    %c0_0 = arith.constant 0 : index
    %0 = vector.load %arg1[%c0, %c0_0] : memref<8x32xf32, #tpu.memory_space<vmem>>, vector<8x32xf32>
    %c0_1 = arith.constant 0 : index
    %c0_2 = arith.constant 0 : index
    %1 = vector.load %arg2[%c0_1, %c0_2] : memref<8x1xi32, #tpu.memory_space<vmem>>, vector<8x1xi32>
    %2 = tpu.iota {dimensions = array<i32: 1>} : vector<8x32xi32>
    %3 = vector.broadcast %1 : vector<8x1xi32> to vector<8x32xi32>
    %4 = arith.cmpi eq, %2, %3 : vector<8x32xi32>
    %cst = arith.constant dense<0xFF800000> : vector<8xf32>
    %5 = vector.multi_reduction <maximumf>, %0, %cst [1] : vector<8x32xf32> to vector<8xf32>
    %6 = vector.shape_cast %5 : vector<8xf32> to vector<8x1xf32>
    %7 = vector.broadcast %6 : vector<8x1xf32> to vector<8x32xf32>
    %8 = arith.subf %0, %7 : vector<8x32xf32>
    %cst_3 = arith.constant 0.000000e+00 : f32
    %9 = vector.broadcast %cst_3 : f32 to vector<8x32xf32>
    %10 = arith.select %4, %8, %9 : vector<8x32xi1>, vector<8x32xf32>
    %cst_4 = arith.constant dense<0.000000e+00> : vector<8xf32>
    %11 = vector.multi_reduction <add>, %10, %cst_4 [1] : vector<8x32xf32> to vector<8xf32>
    %12 = vector.shape_cast %11 : vector<8xf32> to vector<8x1xf32>
    %13 = math.exp %8 : vector<8x32xf32>
    %cst_5 = arith.constant dense<0.000000e+00> : vector<8xf32>
    %14 = vector.multi_reduction <add>, %13, %cst_5 [1] : vector<8x32xf32> to vector<8xf32>
    %15 = vector.shape_cast %14 : vector<8xf32> to vector<8x1xf32>
    %16 = math.log %15 : vector<8x1xf32>
    %17 = arith.subf %16, %12 : vector<8x1xf32>
    %18 = tpu.iota {dimensions = array<i32: 0>} : vector<8x1xi32>
    %c8_i32 = arith.constant 8 : i32
    %19 = arith.muli %arg0, %c8_i32 : i32
    %20 = vector.broadcast %19 : i32 to vector<8x1xi32>
    %21 = arith.addi %18, %20 : vector<8x1xi32>
    %c8_i32_6 = arith.constant 8 : i32
    %22 = vector.broadcast %c8_i32_6 : i32 to vector<8x1xi32>
    %23 = arith.cmpi slt, %21, %22 : vector<8x1xi32>
    %cst_7 = arith.constant 0.000000e+00 : f32
    %24 = vector.broadcast %cst_7 : f32 to vector<8x1xf32>
    %25 = arith.select %23, %17, %24 : vector<8x1xi1>, vector<8x1xf32>
    %26 = vector.shape_cast %25 : vector<8x1xf32> to vector<1x8x1xf32>
    %cst_8 = arith.constant dense<0.000000e+00> : vector<1xf32>
    %27 = vector.multi_reduction <add>, %26, %cst_8 [1, 2] : vector<1x8x1xf32> to vector<1xf32>
    %28 = vector.shape_cast %27 : vector<1xf32> to vector<1x1x1xf32>
    %29 = vector.extract %28[0, 0, 0] : f32 from vector<1x1x1xf32>
    %30 = vector.broadcast %29 : f32 to vector<1x8x128xf32>
    %c0_9 = arith.constant 0 : index
    %c0_10 = arith.constant 0 : index
    %c0_11 = arith.constant 0 : index
    %31 = vector.load %arg3[%c0_9, %c0_10, %c0_11] : memref<1x8x128xf32, #tpu.memory_space<vmem>>, vector<1x8x128xf32>
    tpu.vector_store %arg3[%c0_9, %c0_10, %c0_11], %30 {strides = array<i32>} : memref<1x8x128xf32, #tpu.memory_space<vmem>>, vector<1x8x128xf32>,
    return
  }
  func.func @transform_0(%arg0: i32) -> (i32, i32) {
    %c0_i32 = arith.constant 0 : i32
    %c0_i32_0 = arith.constant 0 : i32
    return %arg0, %c0_i32 : i32, i32
  }
  func.func @transform_1(%arg0: i32) -> (i32, i32) {
    %c0_i32 = arith.constant 0 : i32
    %c0_i32_0 = arith.constant 0 : i32
    return %arg0, %c0_i32 : i32, i32
  }
  func.func @transform_2(%arg0: i32) -> (i32, i32, i32) {
    %c0_i32 = arith.constant 0 : i32
    %c0_i32_0 = arith.constant 0 : i32
    %c0_i32_1 = arith.constant 0 : i32
    return %arg0, %c0_i32, %c0_i32_0 : i32, i32, i32
  }
}

</mosaic_0001>

<bundles_post_ra>
// kernel: tpu_custom_call.1
= control target key start
LH: loop header
LB: loop body
LE: loop exit
PB: predicated region body
PF: predicated region fallthrough
CT: control target
= control target key end

     0   :  { %vm20_vm0 = vcmask 261120   ;;  %s131_s0 = inlined_call_operand.vmem [shape: f32[8,32], index: 0, kind: input, shape index: {}]   ;;  %s132_s1 = inlined_call_operand.vmem [shape: s32[8,1], index: 1, kind: input, shape index: {}]   ;;  %s133_s2 = inlined_call_operand.hbm [shape: f32[1,8,128], index: 2, kind: output, shape index: {}]  }
   0x1   :  { %v12_v0 = vld [vmem:[%s131_s0] sm:$0xff] }
   0x2   :  { %7 = vsyncpa [#allocation3], 0  ;;  %v21_v1 = vsel %vm20_vm0, %v12_v0, -inf  ;;  %v102_v2 = vmov 0   ;;  %v13_v3 = vld [vmem:[%s132_s1] sm:$0xff]  ;;  %v14_v7 = vlaneseq  ;;  %vm44_vm2 = vcmask 7168  }
   0x3   :  { %75 = vset.pattern.permute.xlu0 %v102_v2  ;;  %s103_s0 = smov [#allocation2]  }
   0x4   :  { %22 = vmax.xlane.f32.xlu0 %v21_v1  ;;  %v15_v8 = vand.u32 127, %v14_v7  ;;  %s63_s1 = sshll.u32 %s103_s0, 4  ;;  %s64_s1 = int_to_ptr.vmem [resolvable:$true] %s63_s1 }
   0x5   :  { %s80_s14 = scalar_lea.vmem %s64_s1, 128  ;;  %p85_p1 = scmp.lt.s32.totalorder %s64_s1, %s64_s1 }
   0x6   :  { %p81_p0 = scmp.ne.s32.totalorder %s64_s1, %s80_s14  ;;  %p86_p2 = scmp.lt.s32.totalorder %s80_s14, %s80_s14 }
   0x8   :  { %p87_p3 = por %p86_p2, %p85_p1 }
   0xa   :  { %p88_p4 = pnand %p87_p3, %p81_p0 }
  0x1a   :  { %17 = vperm.xlu0 %75, %v13_v3  }
  0x8d   :  { %v23_v4 = vpop.xlane.xlu0 %22 }
  0x8e   :  { %v24_v5 = vsub.f32 %v12_v0, %v23_v4 }
  0x90   :  { %v29_v6 = vmul.f32 1.442695, %v24_v5 }
  0x92   :  { %76 = vpow2.f32 %v29_v6 }
  0x95   :  { %v18_v9 = vpop.permute.xlu0 %17 }
  0x96   :  { %vm19_vm1 = vcmp.eq.s32.totalorder %v15_v8, %v18_v9 }
  0x97   :  { %v25_v12 = vsel %vm19_vm1, %v24_v5, 0.0 }
  0x98   :  { %v26_v13 = vsel %vm20_vm0, %v25_v12, 0.0 }
  0x9f   :  { %v77_v10 = vpop.eup %76 }
  0xa0   :  { %v31_v11 = vsel %vm20_vm0, %v77_v10, 0.0 }
  0xa1   :  { %32 = vadd.xlane.f32.xlu1 %v31_v11 }
  0xa5   :  { %27 = vadd.xlane.f32.xlu1 %v26_v13 }
 0x12a   :  { %v33_v14 = vpop.xlane.xlu1 %32 }
 0x12b   :  { %78 = vlog2.f32 %v33_v14 }
 0x12e   :  { %v28_v17 = vpop.xlane.xlu1 %27 }
 0x138   :  { %v79_v15 = vpop.eup %78 }
 0x139   :  { %v35_v16 = vmul.f32 0.6931472, %v79_v15 }
 0x13b   :  { %v36_v18 = vsub.f32 %v35_v16, %v28_v17 }
 0x13d   :  { %v45_v19 = vsel %vm44_vm2, %v36_v18, 0.0 }
 0x13e   :  { %46 = vadd.xlane.f32.xlu1 %v45_v19 }
 0x1c7   :  { %v47_v20 = vpop.xlane.xlu1 %46 }
 0x1c8   :  { %v48_v21 = vrot.slane %v47_v20, 4 }
 0x1ca   :  { %v49_v22 = vadd.f32 %v48_v21, %v47_v20 }
 0x1cc   :  { %v50_v23 = vrot.slane %v49_v22, 2 }
 0x1ce   :  { %v51_v24 = vadd.f32 %v50_v23, %v49_v22 }
 0x1d0   :  { %v52_v25 = vrot.slane %v51_v24, 1 }
 0x1d2   :  { %v53_v26 = vadd.f32 %v52_v25, %v51_v24 }
 0x1d4   :  { %71 = vpush %v53_v26 }
 0x205   :  { %s72_s13 = spop %71 }
 0x206   :  { %v55_v27 = vstv %s72_s13 }
 0x207   :  { %56 = vst [vmem:[#allocation2] sm:$0xff] %v55_v27 }
 0x208   :  { %91 = shalt.err (!%p88_p4)
}
 0x209   :  { %66 = dma.vmem_to_hbm [thread:$0]  %s64_s1, 128, %s133_s2, [#allocation3]  }
 0x20a   :  { %100 = dma.done.wait [#allocation3], 128  }
 0x20b   :  { %101 = vsyncadd [#allocation3], 4294967168 }
 0x20c   :  { %70 = vsyncpa [#allocation3], 1 }

</bundles_post_ra>
